<compile_context>
chip_gen: v5e
topology: v5e:2x2
jax: 0.10.0
libtpu: 0.0.40
codegen_flags: <defaults>
</compile_context>

<pallas_src>
import functools

import jax
import jax.numpy as jnp
from jax.experimental import pallas as pl
from jax.experimental.pallas import tpu as pltpu

LN_EPS = 1e-5


def _round_up(x, m):
    return ((x + m - 1) // m) * m


def _make_block_kernel(d_true, d_pad):
    """Fused Add -> LN -> Linear-mixer kernel for one (tm, d_pad) row tile."""
    need_mask = d_true != d_pad
    inv_d = 1.0 / float(d_true)

    def kernel(x_ref, gamma_ref, beta_ref, wt_ref, wb_ref, o_ref):
        x_in = x_ref[...]                      # (tm, d_pad) in storage dtype
        x = x_in.astype(jnp.float32)

        # Resident (1, d_pad) params: read once per grid step.
        gamma = gamma_ref[...]                 # f32
        beta = beta_ref[...]                   # f32
        bias = wb_ref[...]                     # f32

        # LayerNorm over the true hidden dim (padded lanes are zero).
        mean = jnp.sum(x, axis=-1, keepdims=True) * inv_d
        xc = x - mean
        if need_mask:
            lane = jax.lax.broadcasted_iota(jnp.int32, (1, d_pad), 1)
            xc = jnp.where(lane < d_true, xc, 0.0)
        var = jnp.sum(xc * xc, axis=-1, keepdims=True) * inv_d
        inv = jax.lax.rsqrt(var + LN_EPS)
        normed = (xc * inv) * gamma + beta
        # Match PyTorch's `.to(hidden_states.dtype)` before the mixer.
        normed = normed.astype(x_in.dtype)

        # Mixer: y = normed @ W^T. Weight is pre-transposed to (in, out) in the
        # wrapper; operands stay in storage dtype, accumulate in f32 on the MXU.
        mixed = jnp.dot(normed, wt_ref[...], preferred_element_type=jnp.float32)

        # Residual add (drop_path = 0 -> Identity) + bias folded into epilogue.
        o_ref[...] = (x + mixed + bias).astype(o_ref.dtype)

    return kernel


def _vmem_limit_bytes(tm, d_pad, dtype):
    it = jnp.dtype(dtype).itemsize
    tiles = 4 * tm * d_pad * it            # double-buffered input + output tiles
    weight = d_pad * d_pad * it            # resident pre-transposed weight
    params = 3 * d_pad * 4                 # gamma / beta / bias (f32)
    total = tiles + weight + params + (8 << 20)   # compiler-temp headroom
    # Clamp into a range valid on every generation (v7x physical VMEM = 64 MiB).
    return int(min(max(total, 32 << 20), 64 << 20))


@functools.partial(jax.jit, static_argnames=("tm",))
def block_forward(hidden_states, gamma, beta, w, wb, *, tm=256):
    """hidden_states: (B, L, D). Returns (B, L, D) = x + Linear(LN(x))."""
    B, L, D = hidden_states.shape
    dtype = hidden_states.dtype
    rows = B * L

    # Lane-dense hidden dim, sublane-aligned row tile.
    d_pad = _round_up(D, 128)
    itemsize = jnp.dtype(dtype).itemsize
    sub = {4: 8, 2: 16, 1: 32}.get(itemsize, 8)
    tm_eff = max(sub, min(int(tm), _round_up(rows, sub)))
    tm_eff = _round_up(tm_eff, sub)
    rows_pad = _round_up(rows, tm_eff)

    x2d = hidden_states.reshape(rows, D)
    if rows_pad != rows or d_pad != D:
        x2d = jnp.pad(x2d, ((0, rows_pad - rows), (0, d_pad - D)))

    # Pre-transpose the nn.Linear weight once: (out, in) -> (in, out), in the
    # activation dtype so the MXU sees matching (e.g. bf16) operands.
    wt = w.astype(dtype).T
    if d_pad != D:
        pad_d = d_pad - D
        wt = jnp.pad(wt, ((0, pad_d), (0, pad_d)))
        gamma_p = jnp.pad(gamma, (0, pad_d))
        beta_p = jnp.pad(beta, (0, pad_d))
        wb_p = jnp.pad(wb, (0, pad_d))
    else:
        gamma_p, beta_p, wb_p = gamma, beta, wb

    gamma2d = gamma_p.astype(jnp.float32).reshape(1, d_pad)
    beta2d = beta_p.astype(jnp.float32).reshape(1, d_pad)
    wb2d = wb_p.astype(jnp.float32).reshape(1, d_pad)

    kernel = _make_block_kernel(D, d_pad)

    out2d = pl.pallas_call(
        kernel,
        out_shape=jax.ShapeDtypeStruct((rows_pad, d_pad), dtype),
        grid_spec=pltpu.PrefetchScalarGridSpec(
            num_scalar_prefetch=0,
            grid=(rows_pad // tm_eff,),
            in_specs=[
                pl.BlockSpec((tm_eff, d_pad), lambda i: (i, 0)),  # row tile
                pl.BlockSpec((1, d_pad), lambda i: (0, 0)),       # LN gamma
                pl.BlockSpec((1, d_pad), lambda i: (0, 0)),       # LN beta
                pl.BlockSpec((d_pad, d_pad), lambda i: (0, 0)),   # W^T (in,out)
                pl.BlockSpec((1, d_pad), lambda i: (0, 0)),       # mixer bias
            ],
            out_specs=pl.BlockSpec((tm_eff, d_pad), lambda i: (i, 0)),
        ),
        compiler_params=pltpu.CompilerParams(
            dimension_semantics=("parallel",),
            vmem_limit_bytes=_vmem_limit_bytes(tm_eff, d_pad, dtype),
        ),
    )(x2d, gamma2d, beta2d, wt, wb2d)

    return out2d[:rows, :D].reshape(B, L, D)


def block_reference(hidden_states, gamma, beta, w, wb):
    x = hidden_states.astype(jnp.float32)
    mean = jnp.mean(x, axis=-1, keepdims=True)
    var = jnp.mean((x - mean) ** 2, axis=-1, keepdims=True)
    normed = (x - mean) * jax.lax.rsqrt(var + LN_EPS) * gamma + beta
    normed = normed.astype(hidden_states.dtype).astype(jnp.float32)
    mixed = jnp.einsum("bld,od->blo", normed, w.astype(jnp.float32)) + wb
    return (x + mixed).astype(hidden_states.dtype)


if __name__ == "__main__":
    key = jax.random.PRNGKey(0)

    def run_case(B, L, D, dtype=jnp.float32):
        k_x, k_g, k_b, k_w, k_wb = jax.random.split(key, 5)
        hidden_states = jax.random.normal(k_x, (B, L, D), dtype=jnp.float32).astype(dtype)
        gamma = (1.0 + 0.01 * jax.random.normal(k_g, (D,), dtype=jnp.float32))
        beta = 0.01 * jax.random.normal(k_b, (D,), dtype=jnp.float32)
        w = jax.random.normal(k_w, (D, D), dtype=jnp.float32) / jnp.sqrt(D)
        wb = 0.01 * jax.random.normal(k_wb, (D,), dtype=jnp.float32)

        out = block_forward(hidden_states, gamma, beta, w, wb)
        out = jax.block_until_ready(out)
        ref = block_reference(hidden_states, gamma, beta, w, wb)
        assert out.shape == (B, L, D)
        assert jnp.allclose(
            out.astype(jnp.float32), ref.astype(jnp.float32), atol=1e-3, rtol=1e-3
        ), f"mismatch vs reference for shape {(B, L, D)}"

    # Small shape from the original test (exercises the lane-padding path).
    run_case(2, 8, 32)
    # Lane-dense shape (exercises the no-mask path and a multi-row tile).
    run_case(2, 64, 128)

    print("KERNEL_OK")
</pallas_src>

<mosaic_0001>
module attributes {stable_mosaic.version = 11 : i64} {
  func.func @kernel(%arg0: i32, %arg1: memref<16x128xf32, #tpu.memory_space<vmem>>, %arg2: memref<1x128xf32, #tpu.memory_space<vmem>>, %arg3: memref<1x128xf32, #tpu.memory_space<vmem>>, %arg4: memref<128x128xf32, #tpu.memory_space<vmem>>, %arg5: memref<1x128xf32, #tpu.memory_space<vmem>>, %arg6: memref<16x128xf32, #tpu.memory_space<vmem>>) attributes {dimension_semantics = [#tpu.dimension_semantics<parallel>], iteration_bounds = array<i64: 1>, scalar_prefetch = 0 : i64, scratch_operands = 0 : i64, tpu.core_type = #tpu.core_type<tc>, window_params = [{transform_indices = @transform_0, window_bounds = array<i64: 16, 128>}, {pipeline_mode = #tpu.pipeline_mode<synchronous>, transform_indices = @transform_1, window_bounds = array<i64: 1, 128>}, {pipeline_mode = #tpu.pipeline_mode<synchronous>, transform_indices = @transform_2, window_bounds = array<i64: 1, 128>}, {pipeline_mode = #tpu.pipeline_mode<synchronous>, transform_indices = @transform_3, window_bounds = array<i64: 128, 128>}, {pipeline_mode = #tpu.pipeline_mode<synchronous>, transform_indices = @transform_4, window_bounds = array<i64: 1, 128>}, {transform_indices = @transform_5, window_bounds = array<i64: 16, 128>}]} {
    %c0 = arith.constant 0 : index
    %c0_0 = arith.constant 0 : index
    %0 = vector.load %arg1[%c0, %c0_0] : memref<16x128xf32, #tpu.memory_space<vmem>>, vector<16x128xf32>
    %c0_1 = arith.constant 0 : index
    %c0_2 = arith.constant 0 : index
    %1 = vector.load %arg2[%c0_1, %c0_2] : memref<1x128xf32, #tpu.memory_space<vmem>>, vector<1x128xf32>
    %c0_3 = arith.constant 0 : index
    %c0_4 = arith.constant 0 : index
    %2 = vector.load %arg3[%c0_3, %c0_4] : memref<1x128xf32, #tpu.memory_space<vmem>>, vector<1x128xf32>
    %c0_5 = arith.constant 0 : index
    %c0_6 = arith.constant 0 : index
    %3 = vector.load %arg5[%c0_5, %c0_6] : memref<1x128xf32, #tpu.memory_space<vmem>>, vector<1x128xf32>
    %cst = arith.constant dense<0.000000e+00> : vector<16xf32>
    %4 = vector.multi_reduction <add>, %0, %cst [1] : vector<16x128xf32> to vector<16xf32>
    %5 = vector.shape_cast %4 : vector<16xf32> to vector<16x1xf32>
    %cst_7 = arith.constant 3.125000e-02 : f32
    %6 = vector.broadcast %cst_7 : f32 to vector<16x1xf32>
    %7 = arith.mulf %5, %6 : vector<16x1xf32>
    %8 = vector.broadcast %7 : vector<16x1xf32> to vector<16x128xf32>
    %9 = arith.subf %0, %8 : vector<16x128xf32>
    %10 = tpu.iota {dimensions = array<i32: 1>} : vector<1x128xi32>
    %c32_i32 = arith.constant 32 : i32
    %11 = vector.broadcast %c32_i32 : i32 to vector<1x128xi32>
    %12 = arith.cmpi slt, %10, %11 : vector<1x128xi32>
    %cst_8 = arith.constant 0.000000e+00 : f32
    %13 = vector.shape_cast %12 : vector<1x128xi1> to vector<1x128xi1>
    %14 = vector.broadcast %13 : vector<1x128xi1> to vector<16x128xi1>
    %15 = vector.broadcast %cst_8 : f32 to vector<16x128xf32>
    %16 = arith.select %14, %9, %15 : vector<16x128xi1>, vector<16x128xf32>
    %17 = arith.mulf %16, %16 : vector<16x128xf32>
    %cst_9 = arith.constant dense<0.000000e+00> : vector<16xf32>
    %18 = vector.multi_reduction <add>, %17, %cst_9 [1] : vector<16x128xf32> to vector<16xf32>
    %19 = vector.shape_cast %18 : vector<16xf32> to vector<16x1xf32>
    %cst_10 = arith.constant 3.125000e-02 : f32
    %20 = vector.broadcast %cst_10 : f32 to vector<16x1xf32>
    %21 = arith.mulf %19, %20 : vector<16x1xf32>
    %cst_11 = arith.constant 9.99999974E-6 : f32
    %22 = vector.broadcast %cst_11 : f32 to vector<16x1xf32>
    %23 = arith.addf %21, %22 : vector<16x1xf32>
    %24 = math.rsqrt %23 : vector<16x1xf32>
    %25 = vector.broadcast %24 : vector<16x1xf32> to vector<16x128xf32>
    %26 = arith.mulf %16, %25 : vector<16x128xf32>
    %27 = vector.broadcast %1 : vector<1x128xf32> to vector<16x128xf32>
    %28 = arith.mulf %26, %27 : vector<16x128xf32>
    %29 = vector.broadcast %2 : vector<1x128xf32> to vector<16x128xf32>
    %30 = arith.addf %28, %29 : vector<16x128xf32>
    %c0_12 = arith.constant 0 : index
    %c0_13 = arith.constant 0 : index
    %31 = vector.load %arg4[%c0_12, %c0_13] : memref<128x128xf32, #tpu.memory_space<vmem>>, vector<128x128xf32>
    %cst_14 = arith.constant dense<0.000000e+00> : vector<16x128xf32>
    %32 = tpu.matmul %30, %31, %cst_14 {dimension_numbers = #tpu.dot_dimension_numbers<[1], [0], [0], [1], [0, 0, 1, 1], [], []>} : vector<16x128xf32>, vector<128x128xf32>, vector<16x128xf32> -> vector<16x128xf32>
    %33 = arith.addf %0, %32 : vector<16x128xf32>
    %34 = vector.broadcast %3 : vector<1x128xf32> to vector<16x128xf32>
    %35 = arith.addf %33, %34 : vector<16x128xf32>
    %c0_15 = arith.constant 0 : index
    %c0_16 = arith.constant 0 : index
    %36 = vector.load %arg6[%c0_15, %c0_16] : memref<16x128xf32, #tpu.memory_space<vmem>>, vector<16x128xf32>
    tpu.vector_store %arg6[%c0_15, %c0_16], %35 {strides = array<i32>} : memref<16x128xf32, #tpu.memory_space<vmem>>, vector<16x128xf32>,
    return
  }
  func.func @transform_0(%arg0: i32) -> (i32, i32) {
    %c0_i32 = arith.constant 0 : i32
    %c0_i32_0 = arith.constant 0 : i32
    return %arg0, %c0_i32 : i32, i32
  }
  func.func @transform_1(%arg0: i32) -> (i32, i32) {
    %c0_i32 = arith.constant 0 : i32
    %c0_i32_0 = arith.constant 0 : i32
    %c0_i32_1 = arith.constant 0 : i32
    return %c0_i32, %c0_i32_0 : i32, i32
  }
  func.func @transform_2(%arg0: i32) -> (i32, i32) {
    %c0_i32 = arith.constant 0 : i32
    %c0_i32_0 = arith.constant 0 : i32
    %c0_i32_1 = arith.constant 0 : i32
    return %c0_i32, %c0_i32_0 : i32, i32
  }
  func.func @transform_3(%arg0: i32) -> (i32, i32) {
    %c0_i32 = arith.constant 0 : i32
    %c0_i32_0 = arith.constant 0 : i32
    %c0_i32_1 = arith.constant 0 : i32
    return %c0_i32, %c0_i32_0 : i32, i32
  }
  func.func @transform_4(%arg0: i32) -> (i32, i32) {
    %c0_i32 = arith.constant 0 : i32
    %c0_i32_0 = arith.constant 0 : i32
    %c0_i32_1 = arith.constant 0 : i32
    return %c0_i32, %c0_i32_0 : i32, i32
  }
  func.func @transform_5(%arg0: i32) -> (i32, i32) {
    %c0_i32 = arith.constant 0 : i32
    %c0_i32_0 = arith.constant 0 : i32
    return %arg0, %c0_i32 : i32, i32
  }
}

</mosaic_0001>

<bundles_post_ra>
// kernel: block_forward.1
= control target key start
LH: loop header
LB: loop body
LE: loop exit
PB: predicated region body
PF: predicated region fallthrough
CT: control target
= control target key end

     0   :  { %v33_v4 = vlaneseq  ;;  %s276_s0 = inlined_call_operand.vmem [shape: f32[16,128], index: 0, kind: input, shape index: {}]   ;;  %s277_s3 = inlined_call_operand.vmem [shape: f32[128,128], index: 3, kind: input, shape index: {}]   ;;  %s278_s1 = inlined_call_operand.vmem [shape: f32[1,128], index: 1, kind: input, shape index: {}]   ;;  %s279_s2 = inlined_call_operand.vmem [shape: f32[1,128], index: 2, kind: input, shape index: {}]   ;;  %s280_s4 = inlined_call_operand.vmem [shape: f32[1,128], index: 4, kind: input, shape index: {}]   ;;  %s281_s5 = inlined_call_operand.vmem [shape: f32[16,128], index: 5, kind: output, shape index: {}]  }
   0x1   :  { %v190_v0 = vld [vmem:[%s276_s0] sm:$0xff]  ;;  %v196_v1 = vld [vmem:[%s276_s0 + $0x8] sm:$0xff]  ;;  %v97_v2 = vld [vmem:[%s277_s3 + $0x78] sm:$0xff] }
   0x2   :  { %25 = vadd.xlane.f32.xlu0 %v190_v0  ;;  %v96_v3 = vld [vmem:[%s277_s3 + $0x70] sm:$0xff]  ;;  %98 = vmatpush.msra.mxu0 %v97_v2  ;;  %v34_v5 = vand.u32 127, %v33_v4  ;;  %v95_v16 = vld [vmem:[%s277_s3 + $0x68] sm:$0xff]  ;;  %v94_v17 = vld [vmem:[%s277_s3 + $0x60] sm:$0xff] }
   0x3   :  { %134 = vmatpush.msra.mxu1 %v97_v2  ;;  %v93_v18 = vld [vmem:[%s277_s3 + $0x58] sm:$0xff]  ;;  %v92_v19 = vld [vmem:[%s277_s3 + $0x50] sm:$0xff]  ;;  %v91_v20 = vld [vmem:[%s277_s3 + $0x48] sm:$0xff] }
   0x4   :  { %99 = vmatpush.msra.mxu0 %v96_v3  ;;  %vm35_vm0 = vcmp.lt.s32.totalorder %v34_v5, 32  ;;  %v90_v21 = vld [vmem:[%s277_s3 + $0x40] sm:$0xff]  ;;  %v89_v22 = vld [vmem:[%s277_s3 + $0x38] sm:$0xff]  ;;  %v88_v23 = vld [vmem:[%s277_s3 + $0x30] sm:$0xff] }
   0x5   :  { %135 = vmatpush.msra.mxu1 %v96_v3  ;;  %v87_v24 = vld [vmem:[%s277_s3 + $0x28] sm:$0xff]  ;;  %v86_v25 = vld [vmem:[%s277_s3 + $0x20] sm:$0xff]  ;;  %v85_v26 = vld [vmem:[%s277_s3 + $0x18] sm:$0xff] }
   0x6   :  { %100 = vmatpush.msra.mxu0 %v95_v16  ;;  %v84_v27 = vld [vmem:[%s277_s3 + $0x10] sm:$0xff]  ;;  %v83_v28 = vld [vmem:[%s277_s3 + $0x8] sm:$0xff]  ;;  %v82_v29 = vld [vmem:[%s277_s3] sm:$0xff] }
   0x7   :  { %136 = vmatpush.msra.mxu1 %v95_v16  ;;  %v150_v44 = vld [vmem:[%s278_s1] ss:$0 sm:$0xff] }
   0x8   :  { %101 = vmatpush.msra.mxu0 %v94_v17  ;;  %v151_v48 = vld [vmem:[%s279_s2] ss:$0 sm:$0xff] }
   0x9   :  { %137 = vmatpush.msra.mxu1 %v94_v17  ;;  %v152_v58 = vld [vmem:[%s280_s4] ss:$0 sm:$0xff] }
   0xa   :  { %27 = vadd.xlane.f32.xlu0 %v196_v1  ;;  %102 = vmatpush.msra.mxu0 %v93_v18 }
   0xb   :  { %138 = vmatpush.msra.mxu1 %v93_v18 }
   0xc   :  { %103 = vmatpush.msra.mxu0 %v92_v19 }
   0xd   :  { %139 = vmatpush.msra.mxu1 %v92_v19 }
   0xe   :  { %104 = vmatpush.msra.mxu0 %v91_v20 }
   0xf   :  { %140 = vmatpush.msra.mxu1 %v91_v20 }
  0x10   :  { %105 = vmatpush.msra.mxu0 %v90_v21 }
  0x11   :  { %141 = vmatpush.msra.mxu1 %v90_v21 }
  0x12   :  { %106 = vmatpush.msra.mxu0 %v89_v22 }
  0x13   :  { %142 = vmatpush.msra.mxu1 %v89_v22 }
  0x14   :  { %107 = vmatpush.msra.mxu0 %v88_v23 }
  0x15   :  { %143 = vmatpush.msra.mxu1 %v88_v23 }
  0x16   :  { %108 = vmatpush.msra.mxu0 %v87_v24 }
  0x17   :  { %144 = vmatpush.msra.mxu1 %v87_v24 }
  0x18   :  { %109 = vmatpush.msra.mxu0 %v86_v25 }
  0x19   :  { %145 = vmatpush.msra.mxu1 %v86_v25 }
  0x1a   :  { %110 = vmatpush.msra.mxu0 %v85_v26 }
  0x1b   :  { %146 = vmatpush.msra.mxu1 %v85_v26 }
  0x1c   :  { %111 = vmatpush.msra.mxu0 %v84_v27 }
  0x1d   :  { %147 = vmatpush.msra.mxu1 %v84_v27 }
  0x1e   :  { %112 = vmatpush.msra.mxu0 %v83_v28 }
  0x1f   :  { %148 = vmatpush.msra.mxu1 %v83_v28 }
  0x20   :  { %113 = vmatpush.msra.mxu0 %v82_v29 }
  0x21   :  { %149 = vmatpush.msra.mxu1 %v82_v29 }
  0x75   :  { %v26_v6 = vpop.xlane.xlu0 %25 }
  0x76   :  { %v29_v7 = vmul.f32 0.03125, %v26_v6 }
  0x78   :  { %v31_v8 = vsub.f32 %v190_v0, %v29_v7 }
  0x7a   :  { %v206_v9 = vsel %vm35_vm0, %v31_v8, 0.0 }
  0x7b   :  { %v40_v10 = vmul.f32 %v206_v9, %v206_v9 }
  0x7d   :  { %42 = vadd.xlane.f32.xlu1 %v40_v10  ;;  %v28_v11 = vpop.xlane.xlu0 %27 }
  0x7e   :  { %v30_v12 = vmul.f32 0.03125, %v28_v11 }
  0x80   :  { %v32_v13 = vsub.f32 %v196_v1, %v30_v12 }
  0x82   :  { %v211_v14 = vsel %vm35_vm0, %v32_v13, 0.0 }
  0x83   :  { %v41_v15 = vmul.f32 %v211_v14, %v211_v14 }
  0x85   :  { %44 = vadd.xlane.f32.xlu1 %v41_v15 }
  0xf0   :  { %v43_v30 = vpop.xlane.xlu1 %42 }
  0xf1   :  { %v46_v31 = vmul.f32 0.03125, %v43_v30 }
  0xf3   :  { %v48_v32 = vadd.f32 1e-05, %v46_v31 }
  0xf5   :  { %153 = vrsqrt.f32 %v48_v32  ;;  %vm56_vm2 = vweird.f32 %v48_v32 }
  0xf8   :  { %v45_v33 = vpop.xlane.xlu1 %44 }
  0xf9   :  { %v47_v34 = vmul.f32 0.03125, %v45_v33 }
  0xfb   :  { %v154_v35 = vpop.eup %153  ;;  %v49_v36 = vadd.f32 1e-05, %v47_v34 }
  0xfc   :  { %v51_v37 = vmul.f32 %v154_v35, %v48_v32  ;;  %vm57_vm1 = vweird.f32 %v154_v35 }
  0xfd   :  { %155 = vrsqrt.f32 %v49_v36  ;;  %vm58_vm3 = vmor %vm56_vm2, %vm57_vm1  ;;  %vm66_vm5 = vweird.f32 %v49_v36 }
  0xfe   :  { %v52_v38 = vmul.f32 %v154_v35, %v51_v37 }
 0x100   :  { %v53_v39 = vmul.f32 0.5, %v52_v38 }
 0x102   :  { %v54_v40 = vsub.f32 1.5, %v53_v39 }
 0x103   :  { %v156_v41 = vpop.eup %155 }
 0x104   :  { %v55_v42 = vmul.f32 %v154_v35, %v54_v40  ;;  %v61_v43 = vmul.f32 %v156_v41, %v49_v36  ;;  %vm67_vm4 = vweird.f32 %v156_v41 }
 0x105   :  { %vm68_vm6 = vmor %vm66_vm5, %vm67_vm4 }
 0x106   :  { %v62_v45 = vmul.f32 %v156_v41, %v61_v43  ;;  %v59_v46 = vsel %vm58_vm3, %v154_v35, %v55_v42 }
 0x107   :  { %v70_v47 = vmul.f32 %v59_v46, %v206_v9 }
 0x108   :  { %v63_v49 = vmul.f32 0.5, %v62_v45 }
 0x109   :  { %v75_v50 = vmul.f32 %v150_v44, %v70_v47 }
 0x10a   :  { %v64_v51 = vsub.f32 1.5, %v63_v49 }
 0x10b   :  { %v80_v52 = vadd.f32 %v151_v48, %v75_v50 }
 0x10c   :  { %v65_v53 = vmul.f32 %v156_v41, %v64_v51 }
 0x10d   :  { %114 = vmatmul.f32.vlgmr.msra.gmra.mxu0 %v80_v52 }
 0x10e   :  { %v69_v54 = vsel %vm68_vm6, %v156_v41, %v65_v53 }
 0x10f   :  { %v71_v55 = vmul.f32 %v69_v54, %v211_v14 }
 0x111   :  { %v76_v56 = vmul.f32 %v150_v44, %v71_v55 }
 0x113   :  { %v81_v57 = vadd.f32 %v151_v48, %v76_v56 }
 0x115   :  { %117 = vmatmul.f32.vlgmr.msra.gmra.mxu1 %v81_v57 }
 0x18a   :  { %v115_v59 = vpop.f32.mrf.mxu0 }
 0x18b   :  { %v121_v60 = vadd.f32 %v115_v59, %v190_v0 }
 0x18d   :  { %v126_v61 = vadd.f32 %v152_v58, %v121_v60 }
 0x18f   :  { %128 = vst [vmem:[%s281_s5] sm:$0xff] %v126_v61 }
 0x192   :  { %v118_v62 = vpop.f32.mrf.mxu1 }
 0x193   :  { %v122_v63 = vadd.f32 %v118_v62, %v196_v1 }
 0x195   :  { %v127_v2 = vadd.f32 %v152_v58, %v122_v63 }
 0x197   :  { %129 = vst [vmem:[%s281_s5 + $0x8] sm:$0xff] %v127_v2 }

</bundles_post_ra>
